<compile_context>
chip_gen: v7x
topology: tpu7x:2x2x1
jax: 0.10.0
libtpu: 0.0.40
codegen_flags: <defaults>
</compile_context>

<pallas_src>
import functools

import jax
import jax.numpy as jnp
import numpy as np
from jax.experimental import pallas as pl
from jax.experimental.pallas import tpu as pltpu


def _round_up(x, m):
    return ((x + m - 1) // m) * m


def rffn_kernel(x_ref, w1_ref, b1_ref, w2_ref, o_ref, *, cos_dtype):
    # Layer 1 (random Fourier features): (bt, in) @ (in, Hp), f32 accumulate on MXU.
    h = jnp.dot(
        x_ref[...].astype(w1_ref.dtype),
        w1_ref[...],
        preferred_element_type=jnp.float32,
    )
    # Bias add + cos. f32 by default (required for v5e's VPU/EUP); bf16 on
    # v6e/v7x roughly doubles throughput on the single-slot EUP.
    h = jnp.cos(h.astype(cos_dtype) + b1_ref[...].astype(cos_dtype))
    # Layer 2: (bt, Hp) @ (Hp, out), no bias, f32 accumulate.
    y = jnp.dot(
        h.astype(w2_ref.dtype),
        w2_ref[...],
        preferred_element_type=jnp.float32,
    )
    o_ref[...] = y.astype(o_ref.dtype)


def prepare_rffn_params(params, *, use_bf16=True):
    """One-time weight prep (hoisted out of the forward wrapper).

    Only nfeat (the hidden / MXU contraction dim) is padded to a multiple of 128;
    in_dim / out_dim keep their true narrow sizes (full-dim blocks are legal and
    Mosaic pads lanes only in VMEM). Padded hidden lanes produce cos(0)=1 but hit
    zero rows of w2, so the result is exact. Weights are cast once to the matmul
    dtype (bf16 default for v6e/v7x MXU; f32 accumulation is kept in-kernel).
    """
    in_dim, nfeat = params["w1"].shape
    out_dim = params["w2"].shape[1]
    h_pad = _round_up(nfeat, 128)
    mm_dtype = jnp.bfloat16 if use_bf16 else jnp.float32
    w1 = jnp.pad(params["w1"], ((0, 0), (0, h_pad - nfeat))).astype(mm_dtype)
    b1 = jnp.pad(params["b1"], ((0, 0), (0, h_pad - nfeat))).astype(jnp.float32)
    w2 = jnp.pad(params["w2"], ((0, h_pad - nfeat), (0, 0))).astype(mm_dtype)
    return {
        "w1": w1, "b1": b1, "w2": w2,
        "in_dim": in_dim, "out_dim": out_dim,
        "nfeat": nfeat, "h_pad": h_pad, "mm_dtype": mm_dtype,
    }


def rffn_forward(x, prepped, *, batch_tile=512, cos_in_bf16=False):
    """Fused RFFN forward via pallas_call.

    x: (B, in_dim) float32
    prepped: output of prepare_rffn_params (padded/cast weights + metadata)
    """
    B, in_dim = x.shape
    assert in_dim == prepped["in_dim"]
    out_dim = prepped["out_dim"]
    nfeat = prepped["nfeat"]
    h_pad = prepped["h_pad"]
    mm_dtype = prepped["mm_dtype"]
    isz = lambda dt: jnp.dtype(dt).itemsize

    # --- batch tiling: multiple of 8 sublanes; ensure >= 2 grid steps when B
    #     allows so the "parallel" axis can shard across v7x's 2 TensorCores.
    half = _round_up((B + 1) // 2, 8)
    bt = max(8, min((batch_tile // 8) * 8, half))
    grid = (pl.cdiv(B, bt),)  # ragged last block: stores masked by Pallas

    # --- cos dtype: bf16 only when the matmul operands are bf16 (v6e/v7x EUP).
    cos_dtype = jnp.bfloat16 if (cos_in_bf16 and mm_dtype == jnp.bfloat16) else jnp.float32

    # --- VMEM budget: (double-buffered) resident weights + streamed x/out tiles
    #     + f32/cos intermediates; leave headroom under v7x's 64 MiB per-TC VMEM.
    w_bytes = (in_dim * h_pad + h_pad * out_dim) * isz(mm_dtype) + h_pad * 4
    stream_bytes = 2 * bt * (in_dim + out_dim) * isz(x.dtype)
    interm_bytes = 3 * bt * h_pad * 4
    vmem_limit = int(min(max(2 * w_bytes + stream_bytes + interm_bytes, 16 << 20), 48 << 20))

    # --- true (unpadded x/out) traffic and flops for XLA's scheduler.
    cost = pl.CostEstimate(
        flops=2 * B * (in_dim * nfeat + nfeat * out_dim),
        transcendentals=B * nfeat,
        bytes_accessed=B * (in_dim + out_dim) * isz(x.dtype) + w_bytes,
    )

    def resident(shape):
        # Weights: fetched once (constant index_map), VMEM-resident across steps.
        return pl.BlockSpec(shape, lambda i: (0, 0))

    return pl.pallas_call(
        functools.partial(rffn_kernel, cos_dtype=cos_dtype),
        out_shape=jax.ShapeDtypeStruct((B, out_dim), x.dtype),
        grid_spec=pltpu.PrefetchScalarGridSpec(
            num_scalar_prefetch=0,
            grid=grid,
            in_specs=[
                pl.BlockSpec((bt, in_dim), lambda i: (i, 0)),  # streamed x tile, narrow last dim
                resident(prepped["w1"].shape),                 # (in_dim, h_pad)
                resident(prepped["b1"].shape),                 # (1, h_pad)
                resident(prepped["w2"].shape),                 # (h_pad, out_dim)
            ],
            out_specs=pl.BlockSpec((bt, out_dim), lambda i: (i, 0)),  # narrow last dim, masked vst
        ),
        compiler_params=pltpu.CompilerParams(
            dimension_semantics=("parallel",),
            vmem_limit_bytes=vmem_limit,
        ),
        cost_estimate=cost,
    )(x, prepped["w1"], prepped["b1"], prepped["w2"])


def init_rffn_params(key, in_dim, out_dim, nfeat, sigma=10.0):
    """Matches the torch RFFN init scheme (values differ since RNGs differ):
    coeff ~ N(0,1)/sigma, offset ~ 2*pi*U(0,1), output Linear ~ U(+-1/sqrt(nfeat))."""
    k1, k2, k3 = jax.random.split(key, 3)
    coeff = jax.random.normal(k1, (nfeat, in_dim), jnp.float32) / jnp.asarray(
        np.ones(in_dim) * sigma, jnp.float32
    ).reshape(1, in_dim)
    offset = 2.0 * jnp.pi * jax.random.uniform(k2, (1, nfeat), jnp.float32)
    bound = 1.0 / np.sqrt(nfeat)
    w_out = jax.random.uniform(k3, (out_dim, nfeat), jnp.float32, -bound, bound)
    return {
        "w1": coeff.T,  # (in_dim, nfeat)
        "b1": offset,   # (1, nfeat)
        "w2": w_out.T,  # (nfeat, out_dim)
    }


def rffn_reference(x, p):
    """Pure-JAX reference for correctness checking."""
    return jnp.cos(x @ p["w1"] + p["b1"]) @ p["w2"]


if __name__ == "__main__":
    key = jax.random.PRNGKey(0)
    k_param, k_x, k_param2, k_x2 = jax.random.split(key, 4)

    # Case 1: small shapes consistent with the module (RFFN(in_dim, out_dim, nfeat)); exact f32 path.
    batch, in_dim, nfeat, out_dim = 8, 4, 32, 4
    params = init_rffn_params(k_param, in_dim, out_dim, nfeat, sigma=10.0)
    x = jax.random.normal(k_x, (batch, in_dim), jnp.float32)
    prepped_f32 = prepare_rffn_params(params, use_bf16=False)

    out = jax.block_until_ready(rffn_forward(x, prepped_f32))
    ref = rffn_reference(x, params)
    np.testing.assert_allclose(np.asarray(out), np.asarray(ref), rtol=1e-5, atol=1e-5)

    # Case 2: ragged batch (no batch padding), multi-step grid (bt=256 -> grid=2),
    # narrow unpadded in/out dims.
    batch2, in_dim2, nfeat2, out_dim2 = 500, 3, 200, 5
    params2 = init_rffn_params(k_param2, in_dim2, out_dim2, nfeat2, sigma=10.0)
    x2 = jax.random.normal(k_x2, (batch2, in_dim2), jnp.float32)
    ref2 = rffn_reference(x2, params2)

    # f32 matmul path (exact).
    prepped2_f32 = prepare_rffn_params(params2, use_bf16=False)
    out2 = jax.block_until_ready(rffn_forward(x2, prepped2_f32, batch_tile=512))
    np.testing.assert_allclose(np.asarray(out2), np.asarray(ref2), rtol=1e-5, atol=1e-5)

    # bf16 MXU operands (default prep; right choice on v6e/v7x), f32 accumulate + f32 cos.
    prepped2_bf16 = prepare_rffn_params(params2, use_bf16=True)
    out2_bf16 = jax.block_until_ready(rffn_forward(x2, prepped2_bf16, batch_tile=512))
    np.testing.assert_allclose(np.asarray(out2_bf16), np.asarray(ref2), rtol=3e-2, atol=3e-2)

    # bf16 bias-add + cos (v6e/v7x EUP path; correct-but-slower on v5e).
    out2_bf16c = jax.block_until_ready(
        rffn_forward(x2, prepped2_bf16, batch_tile=512, cos_in_bf16=True)
    )
    np.testing.assert_allclose(np.asarray(out2_bf16c), np.asarray(ref2), rtol=5e-2, atol=5e-2)

    print("KERNEL_OK")
</pallas_src>

<mosaic_0001>
module attributes {stable_mosaic.version = 11 : i64} {
  func.func @rffn_kernel(%arg0: i32, %arg1: memref<8x4xf32, #tpu.memory_space<vmem>>, %arg2: memref<4x128xf32, #tpu.memory_space<vmem>>, %arg3: memref<1x128xf32, #tpu.memory_space<vmem>>, %arg4: memref<128x4xf32, #tpu.memory_space<vmem>>, %arg5: memref<8x4xf32, #tpu.memory_space<vmem>>) attributes {dimension_semantics = [#tpu.dimension_semantics<parallel>], iteration_bounds = array<i64: 1>, scalar_prefetch = 0 : i64, scratch_operands = 0 : i64, tpu.core_type = #tpu.core_type<tc>, window_params = [{transform_indices = @transform_0, window_bounds = array<i64: 8, 4>}, {pipeline_mode = #tpu.pipeline_mode<synchronous>, transform_indices = @transform_1, window_bounds = array<i64: 4, 128>}, {pipeline_mode = #tpu.pipeline_mode<synchronous>, transform_indices = @transform_2, window_bounds = array<i64: 1, 128>}, {pipeline_mode = #tpu.pipeline_mode<synchronous>, transform_indices = @transform_3, window_bounds = array<i64: 128, 4>}, {transform_indices = @transform_4, window_bounds = array<i64: 8, 4>}]} {
    %c0 = arith.constant 0 : index
    %c0_0 = arith.constant 0 : index
    %0 = vector.load %arg1[%c0, %c0_0] : memref<8x4xf32, #tpu.memory_space<vmem>>, vector<8x4xf32>
    %c0_1 = arith.constant 0 : index
    %c0_2 = arith.constant 0 : index
    %1 = vector.load %arg2[%c0_1, %c0_2] : memref<4x128xf32, #tpu.memory_space<vmem>>, vector<4x128xf32>
    %cst = arith.constant dense<0.000000e+00> : vector<8x128xf32>
    %2 = tpu.matmul %0, %1, %cst {dimension_numbers = #tpu.dot_dimension_numbers<[1], [0], [0], [1], [0, 0, 1, 1], [], []>} : vector<8x4xf32>, vector<4x128xf32>, vector<8x128xf32> -> vector<8x128xf32>
    %c0_3 = arith.constant 0 : index
    %c0_4 = arith.constant 0 : index
    %3 = vector.load %arg3[%c0_3, %c0_4] : memref<1x128xf32, #tpu.memory_space<vmem>>, vector<1x128xf32>
    %4 = vector.broadcast %3 : vector<1x128xf32> to vector<8x128xf32>
    %5 = arith.addf %2, %4 : vector<8x128xf32>
    %6 = math.cos %5 : vector<8x128xf32>
    %c0_5 = arith.constant 0 : index
    %c0_6 = arith.constant 0 : index
    %7 = vector.load %arg4[%c0_5, %c0_6] : memref<128x4xf32, #tpu.memory_space<vmem>>, vector<128x4xf32>
    %cst_7 = arith.constant dense<0.000000e+00> : vector<8x4xf32>
    %8 = tpu.matmul %6, %7, %cst_7 {dimension_numbers = #tpu.dot_dimension_numbers<[1], [0], [0], [1], [0, 0, 1, 1], [], []>} : vector<8x128xf32>, vector<128x4xf32>, vector<8x4xf32> -> vector<8x4xf32>
    %c0_8 = arith.constant 0 : index
    %c0_9 = arith.constant 0 : index
    %9 = vector.load %arg5[%c0_8, %c0_9] : memref<8x4xf32, #tpu.memory_space<vmem>>, vector<8x4xf32>
    tpu.vector_store %arg5[%c0_8, %c0_9], %8 {strides = array<i32>} : memref<8x4xf32, #tpu.memory_space<vmem>>, vector<8x4xf32>,
    return
  }
  func.func @transform_0(%arg0: i32) -> (i32, i32) {
    %c0_i32 = arith.constant 0 : i32
    %c0_i32_0 = arith.constant 0 : i32
    return %arg0, %c0_i32 : i32, i32
  }
  func.func @transform_1(%arg0: i32) -> (i32, i32) {
    %c0_i32 = arith.constant 0 : i32
    %c0_i32_0 = arith.constant 0 : i32
    %c0_i32_1 = arith.constant 0 : i32
    return %c0_i32, %c0_i32_0 : i32, i32
  }
  func.func @transform_2(%arg0: i32) -> (i32, i32) {
    %c0_i32 = arith.constant 0 : i32
    %c0_i32_0 = arith.constant 0 : i32
    %c0_i32_1 = arith.constant 0 : i32
    return %c0_i32, %c0_i32_0 : i32, i32
  }
  func.func @transform_3(%arg0: i32) -> (i32, i32) {
    %c0_i32 = arith.constant 0 : i32
    %c0_i32_0 = arith.constant 0 : i32
    %c0_i32_1 = arith.constant 0 : i32
    return %c0_i32, %c0_i32_0 : i32, i32
  }
  func.func @transform_4(%arg0: i32) -> (i32, i32) {
    %c0_i32 = arith.constant 0 : i32
    %c0_i32_0 = arith.constant 0 : i32
    return %arg0, %c0_i32 : i32, i32
  }
}

</mosaic_0001>

<bundles_post_ra>
// kernel: tpu_custom_call.1
= control target key start
LH: loop header
LB: loop body
LE: loop exit
PB: predicated region body
PF: predicated region fallthrough
CT: control target
= control target key end

     0   :  { %vm30_vm0 = vcmask 1043456   ;;  %vm26_vm1 = vcmask 31744   ;;  %v405_v0 = vmov 0.0   ;;  %vm406_vm2 = vmmov 0   ;;  %s522_s1 = inlined_call_operand.vmem [shape: f32[4,128], index: 1, kind: input, shape index: {}]   ;;  %s523_s0 = inlined_call_operand.vmem [shape: f32[8,4], index: 0, kind: input, shape index: {}]   ;;  %s524_s3 = inlined_call_operand.vmem [shape: f32[128,4], index: 3, kind: input, shape index: {}]   ;;  %s525_s2 = inlined_call_operand.vmem [shape: f32[1,128], index: 2, kind: input, shape index: {}]   ;;  %s526_s4 = inlined_call_operand.vmem [shape: f32[8,4], index: 4, kind: output, shape index: {}]  }
   0x1   :  { %324 = vmatprep.subr.mxu0 %v405_v0  ;;  %v18_v1 = vld [vmem:[%s522_s1] sm:$0xf]  ;;  %326 = vmatprep.mubr.msk.f32.mxu0 %vm406_vm2, %v405_v0  ;;  %v407_v3 = vmov 0.0|0.0   ;;  %v208_v5 = vld [vmem:[%s524_s3 + $0x8] sm:$0xff]  ;;  %v209_v6 = vld [vmem:[%s524_s3 + $0x10] sm:$0xff] }
   0x2   :  { %v17_v2 = vld [vmem:[%s523_s0] sm:$0xff]  ;;  %325 = vmatpush3.msk.msra.mxu0 %vm30_vm0, %v18_v1  ;;  %361 = vmatprep.mubr.msk.f32.mxu1 %vm406_vm2, %v405_v0  ;;  %v210_v8 = vld [vmem:[%s524_s3 + $0x18] sm:$0xff]  ;;  %v212_v11 = vld [vmem:[%s524_s3 + $0x28] sm:$0xff]  ;;  %v408_v43 = vmov 2102212464  }
   0x3   :  { %327 = vmatmul.mubr.msk.f32.vlgmr.msra.gmra.mrb[0].mxu0 %vm26_vm1, %v17_v2  ;;  %364 = vmatprep.subr.bf16.mxu1 %v407_v3  ;;  %v207_v4 = vld [vmem:[%s524_s3] sm:$0xff]  ;;  %v368_v9 = vpack.c.bf16 %v210_v8, %v209_v6  ;;  %v213_v13 = vld [vmem:[%s524_s3 + $0x30] sm:$0xff]  ;;  %v214_v14 = vld [vmem:[%s524_s3 + $0x38] sm:$0xff]  ;;  %v409_v45 = vmov 920167782  }
   0x4   :  { %v365_v7 = vpack.c.bf16 %v208_v5, %v207_v4  ;;  %v211_v10 = vld [vmem:[%s524_s3 + $0x20] sm:$0xff]  ;;  %v374_v15 = vpack.c.bf16 %v214_v14, %v213_v13  ;;  %v216_v17 = vld [vmem:[%s524_s3 + $0x48] sm:$0xff]  ;;  %v217_v19 = vld [vmem:[%s524_s3 + $0x50] sm:$0xff]  ;;  %v410_v49 = vmov 1326507024  }
   0x5   :  { %v371_v12 = vpack.c.bf16 %v212_v11, %v211_v10  ;;  %v215_v16 = vld [vmem:[%s524_s3 + $0x40] sm:$0xff]  ;;  %v218_v20 = vld [vmem:[%s524_s3 + $0x58] sm:$0xff]  ;;  %v220_v23 = vld [vmem:[%s524_s3 + $0x68] sm:$0xff]  ;;  %v411_v51 = vmov 683565275  }
   0x6   :  { %366 = vmatpush3.bf16.msra.mxu1 %v365_v7  ;;  %v377_v18 = vpack.c.bf16 %v216_v17, %v215_v16  ;;  %v380_v21 = vpack.c.bf16 %v218_v20, %v217_v19  ;;  %v219_v22 = vld [vmem:[%s524_s3 + $0x60] sm:$0xff]  ;;  %v221_v25 = vld [vmem:[%s524_s3 + $0x70] sm:$0xff]  ;;  %v222_v26 = vld [vmem:[%s524_s3 + $0x78] sm:$0xff]  ;;  %v412_v53 = vmov 2475754826  }
   0x7   :  { %367 = vmatprep.subr.bf16.mxu1 %v407_v3  ;;  %v383_v24 = vpack.c.bf16 %v220_v23, %v219_v22  ;;  %v386_v27 = vpack.c.bf16 %v222_v26, %v221_v25  ;;  %v298_v28 = vld [vmem:[%s525_s2] ss:$0 sm:$0xff]  ;;  %v413_v56 = vmov 2131351028  }
   0xa   :  { %369 = vmatpush3.bf16.msra.mxu1 %v368_v9 }
   0xb   :  { %370 = vmatprep.subr.bf16.mxu1 %v407_v3 }
   0xe   :  { %372 = vmatpush3.bf16.msra.mxu1 %v371_v12 }
   0xf   :  { %373 = vmatprep.subr.bf16.mxu1 %v407_v3 }
  0x12   :  { %375 = vmatpush3.bf16.msra.mxu1 %v374_v15 }
  0x13   :  { %376 = vmatprep.subr.bf16.mxu1 %v407_v3 }
  0x16   :  { %378 = vmatpush3.bf16.msra.mxu1 %v377_v18 }
  0x17   :  { %379 = vmatprep.subr.bf16.mxu1 %v407_v3 }
  0x1a   :  { %381 = vmatpush3.bf16.msra.mxu1 %v380_v21 }
  0x1b   :  { %382 = vmatprep.subr.bf16.mxu1 %v407_v3 }
  0x1e   :  { %384 = vmatpush3.bf16.msra.mxu1 %v383_v24 }
  0x1f   :  { %385 = vmatprep.subr.bf16.mxu1 %v407_v3 }
  0x22   :  { %387 = vmatpush3.bf16.msra.mxu1 %v386_v27 }
  0xd6   :  { %v100_v29 = vpop.f32.mrb[0].mxu0 }
  0xd7   :  { %v497_v30 = vadd.f32 %v298_v28, %v100_v29  ;;  %v328_v31 = vpop.f32.mrb[1].mxu0 }
  0xd9   :  { %v107_v32 = vand.u32 2139095040, %v497_v30  ;;  %v104_v33 = vand.u32 2147483647, %v497_v30  ;;  %vm106_vm10 = vcmp.lt.s32.totalorder %v497_v30, 0  ;;  %vm196_vm15 = vweird.f32 %v497_v30 }
  0xdb   :  { %v108_v34 = vshrl.u32 %v107_v32, 23  ;;  %v111_v36 = vand.u32 8388607, %v104_v33  ;;  %vm105_vm11 = vcmp.le.f32.partialorder %v104_v33, 0.7853982 }
  0xdd   :  { %v301_v35 = vadd.s32 4294967169, %v108_v34  ;;  %v112_v39 = vor.u32 8388608, %v111_v36 }
  0xdf   :  { %v114_v37 = vadd.s32 1, %v301_v35  ;;  %v152_v47 = vshll.u32 %v112_v39, 8 }
  0xe1   :  { %vm115_vm3 = vcmp.gt.s32.totalorder %v114_v37, 0 }
  0xe2   :  { %v116_v38 = vsel %vm115_vm3, %v114_v37, 0 }
  0xe3   :  { %v118_v40 = vand.u32 31, %v116_v38  ;;  %v117_v41 = vshrl.u32 %v116_v38, 5 }
  0xe5   :  { %v119_v42 = vsub.s32 32, %v118_v40  ;;  %v130_v44 = vshll.u32 %v408_v43, %v118_v40  ;;  %v133_v46 = vshll.u32 %v409_v45, %v118_v40  ;;  %v121_v52 = vshll.u32 %v411_v51, %v118_v40 }
  0xe6   :  { %v124_v55 = vshll.u32 %v412_v53, %v118_v40  ;;  %v127_v58 = vshll.u32 %v413_v56, %v118_v40  ;;  %vm139_vm4 = vcmp.lt.s32.totalorder %v117_v41, 4  ;;  %vm136_vm5 = vcmp.lt.s32.totalorder %v117_v41, 1 }
  0xe7   :  { %v131_v48 = vshrl.u32 %v409_v45, %v119_v42  ;;  %v134_v50 = vshrl.u32 %v410_v49, %v119_v42  ;;  %v122_v54 = vshrl.u32 %v412_v53, %v119_v42  ;;  %v125_v57 = vshrl.u32 %v413_v56, %v119_v42 }
  0xe8   :  { %v128_v59 = vshrl.u32 %v408_v43, %v119_v42  ;;  %v120_v63 = vshrl.u32 %v411_v51, %v119_v42  ;;  %vm137_vm6 = vcmp.lt.s32.totalorder %v117_v41, 2  ;;  %vm138_vm7 = vcmp.lt.s32.totalorder %v117_v41, 3 }
  0xe9   :  { %v132_v60 = vor.u32 %v131_v48, %v130_v44  ;;  %v135_v61 = vor.u32 %v134_v50, %v133_v46  ;;  %v123_v62 = vor.u32 %v122_v54, %v121_v52  ;;  %v126_v0 = vor.u32 %v125_v57, %v124_v55 }
  0xea   :  { %v129_v1 = vor.u32 %v128_v59, %v127_v58 }
  0xeb   :  { %v145_v2 = vsel %vm139_vm4, %v132_v60, 920167782  ;;  %v149_v3 = vsel %vm139_vm4, %v135_v61, 1326507024  ;;  %v144_v5 = vsel %vm136_vm5, %v123_v62, %v126_v0  ;;  %v140_v8 = vsel %vm136_vm5, %v120_v63, %v123_v62 }
  0xec   :  { %v141_v4 = vsel %vm139_vm4, %v129_v1, 2102212464  ;;  %v146_v6 = vsel %vm138_vm7, %v129_v1, %v145_v2  ;;  %v148_v7 = vsel %vm136_vm5, %v126_v0, %v129_v1  ;;  %v150_v11 = vsel %vm138_vm7, %v132_v60, %v149_v3 }
  0xed   :  { %v142_v9 = vsel %vm138_vm7, %v126_v0, %v141_v4  ;;  %v147_v10 = vsel %vm137_vm6, %v144_v5, %v146_v6  ;;  %v151_v12 = vsel %vm137_vm6, %v148_v7, %v150_v11 }
  0xee   :  { %v503_v13 = vmul.u32.u64.low %v152_v47, %v147_v10  ;;  %v504_v14 = vmul.u32.u64.high %v152_v47, %v147_v10, %v503_v13  ;;  %v506_v15 = vmul.u32.u64.low %v152_v47, %v151_v12  ;;  %v507_v16 = vmul.u32.u64.high %v152_v47, %v151_v12, %v506_v15 }
  0xef   :  { %v143_v17 = vsel %vm137_vm6, %v140_v8, %v142_v9 }
  0xf0   :  { %v162_v18 = vadd.s32 1, %v504_v14  ;;  %v159_v19 = vmul.u32 %v152_v47, %v143_v17  ;;  %vm161_vm8 = vc.u32 %v507_v16, %v503_v13  ;;  %v160_v32 = vadd.s32 %v503_v13, %v507_v16 }
  0xf2   :  { %v163_v20 = vsel %vm161_vm8, %v162_v18, %v504_v14 }
  0xf3   :  { %v164_v21 = vadd.s32 %v163_v20, %v159_v19 }
  0xf5   :  { %v165_v22 = vadd.s32 536870912, %v164_v21 }
  0xf7   :  { %v166_v23 = vshrl.u32 %v165_v22, 30 }
  0xf9   :  { %v167_v24 = vshll.u32 %v166_v23, 30  ;;  %v190_v47 = vsub.s32 4, %v166_v23 }
  0xfb   :  { %v168_v25 = vsub.s32 %v164_v21, %v167_v24  ;;  %v191_v49 = vsel %vm106_vm10, %v190_v47, %v166_v23 }
  0xfc   :  { %v193_v50 = vsel %vm105_vm11, 0, %v191_v49 }
  0xfd   :  { %v170_v26 = vsub.s32 0, %v168_v25  ;;  %v197_v51 = vand.u32 3, %v193_v50 }
  0xff   :  { %v302_v27 = vmin.u32 %v170_v26, %v168_v25  ;;  %vm202_vm12 = vcmp.eq.s32.totalorder %v197_v51, 2  ;;  %vm199_vm13 = vcmp.eq.s32.totalorder %v197_v51, 0  ;;  %vm198_vm14 = vcmp.lt.s32.totalorder %v197_v51, 2 }
 0x101   :  { %v172_v28 = vclz %v302_v27 }
 0x103   :  { %v303_v29 = vadd.s32 4294967294, %v172_v28 }
 0x105   :  { %vm304_vm9 = vcmp.lt.s32.totalorder %v303_v29, 0 }
 0x106   :  { %v175_v31 = vsel %vm304_vm9, 0, %v303_v29 }
 0x107   :  { %v176_v34 = vsub.s32 32, %v175_v31  ;;  %v180_v35 = vsub.s32 4294967266, %v175_v31  ;;  %v177_v36 = vshll.u32 %v168_v25, %v175_v31 }
 0x109   :  { %v178_v37 = vshrl.u32 %v160_v32, %v176_v34  ;;  %v181_v38 = vadd.s32 127, %v180_v35 }
 0x10b   :  { %v179_v39 = vor.u32 %v178_v37, %v177_v36  ;;  %v182_v40 = vshll.u32 %v181_v38, 23 }
 0x10d   :  { %v183_v41 = vor.u32 4788187, %v182_v40  ;;  %v186_v43 = vcvt.s32.f32 %v179_v39 }
 0x10f   :  { %v184_v42 = vand.u32 2147483647, %v183_v41 }
 0x111   :  { %v187_v44 = vmul.f32 %v186_v43, %v184_v42 }
 0x113   :  { %v188_v45 = vxor.u32 2147483648, %v187_v44 }
 0x115   :  { %v189_v46 = vsel %vm106_vm10, %v188_v45, %v187_v44 }
 0x116   :  { %v192_v48 = vsel %vm105_vm11, %v497_v30, %v189_v46 }
 0x117   :  { %401 = vcosq.f32 %v192_v48 }
 0x118   :  { %403 = vsinq.f32 %v192_v48 }
 0x121   :  { %v402_v52 = vpop.eup %401 }
 0x122   :  { %v404_v53 = vpop.eup %403  ;;  %v203_v54 = vxor.u32 2147483648, %v402_v52 }
 0x123   :  { %v200_v55 = vxor.u32 2147483648, %v404_v53 }
 0x124   :  { %v204_v56 = vsel %vm202_vm12, %v203_v54, %v404_v53 }
 0x125   :  { %v201_v57 = vsel %vm199_vm13, %v402_v52, %v200_v55 }
 0x126   :  { %v205_v33 = vsel %vm198_vm14, %v201_v57, %v204_v56 }
 0x127   :  { %v206_v58 = vsel %vm196_vm15, nan, %v205_v33 }
 0x128   :  { %362 = vmatmul.mubr.f32.vlgmr.msra.gmra.mrb[0].mxu1 %v206_v58 }
 0x1fb   :  { %v289_v59 = vpop.f32.mrb[0].mxu1 }
 0x1fc   :  { %293 = vst.msk [vmem:[%s526_s4] sm:$0xff] %vm26_vm1, %v289_v59  ;;  %v363_v60 = vpop.f32.mrb[1].mxu1 }

</bundles_post_ra>
